<compile_context>
chip_gen: v7x
topology: tpu7x:2x2x1
jax: 0.10.0
libtpu: 0.0.40
codegen_flags: <defaults>
</compile_context>

<pallas_src>
import functools

import jax
import jax.numpy as jnp
from jax.experimental import pallas as pl
from jax.experimental.pallas import tpu as pltpu

LANES = 128
SUBLANES = 8                        # f32 sublane tile; fold granularity
NUM_CORE_SPLITS = 2                 # engage both v7x TensorCores; harmless on 1-TC chips
MAX_TILE_ROWS = 4096                # (4096,128)xf32 = 2 MiB per input block
VMEM_LIMIT_BYTES = 32 * 1024 * 1024  # explicit: above v5e's 16 MiB default scoped limit

# Minimum sublane multiple for the second-to-last block dim, per input dtype.
_SUBLANE_MULT = {"float32": 8, "bfloat16": 16, "float16": 16}


def _sce_elem(x, t):
    # -x*target + max(x, 0) + log(1 + exp(-|x|)); log1p is the numerically
    # stable spelling of log(1 + e) and matches PyTorch within tolerance.
    return -x * t + jnp.maximum(x, 0.0) + jnp.log1p(jnp.exp(-jnp.abs(x)))


def _sce_ref(x, t):
    """Pure-JAX fallback / reference (full module semantics)."""
    xf = x.astype(jnp.float32)
    tf = t.astype(jnp.float32)
    return jnp.abs(jnp.mean(_sce_elem(xf, tf)))


def _sce_sum_kernel(x_ref, t_ref, out_ref, *, rows, tile_rows,
                    steps_per_core, full_blocks, total_steps):
    """Streaming reduction: per-core (8,128) partial sums in out_ref."""
    p = pl.program_id(0)          # parallel (core-split) axis
    i = pl.program_id(1)          # reduction axis

    @pl.when(i == 0)
    def _():
        out_ref[...] = jnp.zeros_like(out_ref)

    x = x_ref[...].astype(jnp.float32)
    t = t_ref[...].astype(jnp.float32)
    elem = _sce_elem(x, t)

    def fold(e):
        # (tile_rows, 128) -> (8, 128): pure vreg-wise VALU adds, no XLU.
        return e.reshape(tile_rows // SUBLANES, SUBLANES, LANES).sum(axis=0)

    if full_blocks == total_steps:
        # rows % tile_rows == 0 and every grid step maps to a distinct block:
        # no masking anywhere (statically removed).
        out_ref[...] += fold(elem)
    else:
        b = p * steps_per_core + i    # logical (unclamped) global block index

        @pl.when(b < full_blocks)
        def _():
            out_ref[...] += fold(elem)

        @pl.when(b >= full_blocks)
        def _():
            # Partial final block and/or blocks duplicated by the clamped
            # index_map.  Use a select (NOT multiply-by-mask) so NaN/Inf in
            # garbage rows cannot leak into the accumulator.
            row_ids = b * tile_rows + jax.lax.broadcasted_iota(
                jnp.int32, elem.shape, 0)
            out_ref[...] += fold(jnp.where(row_ids < rows, elem, 0.0))


def sigmoid_cross_entropy_loss(x, target):
    """Replicates SigmoidCrossEntropyLoss.forward(x, target) -> scalar."""
    assert x.shape == target.shape
    n_elem = x.size

    def canon(a):
        # f32 / bf16 / f16 stream through the kernel natively (upcast inside
        # the kernel) to keep HBM traffic minimal; anything else is cast once.
        return a if a.dtype.name in _SUBLANE_MULT else a.astype(jnp.float32)

    xf = jnp.ravel(canon(x))
    tf = jnp.ravel(canon(target))

    sub = max(_SUBLANE_MULT[xf.dtype.name], _SUBLANE_MULT[tf.dtype.name])

    # Fallback: a non-128-divisible size would force a materialized pad/slice
    # copy of the whole tensor (extra HBM pass), and tiny sizes are not worth
    # a kernel launch.  Handle those fully in JAX instead.
    # TODO(synk): a 1-D-block kernel variant could cover n_elem % 128 != 0.
    if n_elem == 0 or n_elem % LANES != 0 or (n_elem // LANES) < sub:
        return _sce_ref(xf, tf)

    rows = n_elem // LANES
    x2 = xf.reshape(rows, LANES)      # metadata-only reshape, no copy
    t2 = tf.reshape(rows, LANES)

    tile_rows = min(MAX_TILE_ROWS, (rows // sub) * sub)   # multiple of `sub`
    num_blocks = pl.cdiv(rows, tile_rows)
    steps_per_core = pl.cdiv(num_blocks, NUM_CORE_SPLITS)
    total_steps = NUM_CORE_SPLITS * steps_per_core
    full_blocks = rows // tile_rows   # blocks needing no mask

    def in_index_map(p, i):
        # Clamp so out-of-range steps of the core split re-read an in-bounds
        # block; their contribution is masked to zero inside the kernel.
        b = jnp.minimum(p * steps_per_core + i, num_blocks - 1)
        return (b, 0)

    kernel = functools.partial(
        _sce_sum_kernel, rows=rows, tile_rows=tile_rows,
        steps_per_core=steps_per_core, full_blocks=full_blocks,
        total_steps=total_steps)

    cost = pl.CostEstimate(
        flops=6 * n_elem,
        transcendentals=2 * n_elem,
        bytes_accessed=n_elem * (x2.dtype.itemsize + t2.dtype.itemsize)
        + NUM_CORE_SPLITS * SUBLANES * LANES * 4,
    )

    partials = pl.pallas_call(
        kernel,
        out_shape=jax.ShapeDtypeStruct(
            (NUM_CORE_SPLITS * SUBLANES, LANES), jnp.float32),
        grid_spec=pltpu.PrefetchScalarGridSpec(
            num_scalar_prefetch=0,
            grid=(NUM_CORE_SPLITS, steps_per_core),
            in_specs=[
                pl.BlockSpec((tile_rows, LANES), in_index_map),
                pl.BlockSpec((tile_rows, LANES), in_index_map),
            ],
            out_specs=pl.BlockSpec((SUBLANES, LANES), lambda p, i: (p, 0)),
        ),
        compiler_params=pltpu.CompilerParams(
            dimension_semantics=("parallel", "arbitrary"),
            vmem_limit_bytes=VMEM_LIMIT_BYTES),
        cost_estimate=cost,
    )(x2, t2)

    total = jnp.sum(partials)
    return jnp.abs(total / jnp.float32(n_elem))


if __name__ == "__main__":
    def _ref(x, t):
        xf = x.astype(jnp.float32)
        tf = t.astype(jnp.float32)
        tmp = 1.0 + jnp.exp(-jnp.abs(xf))
        return jnp.abs(
            jnp.mean(-xf * tf + jnp.maximum(xf, 0.0) + jnp.log(tmp)))

    # Main case: small NCHW logits + {0,1} targets (kernel fast path).
    key = jax.random.PRNGKey(0)
    kx, kt = jax.random.split(key)
    x = jax.random.normal(kx, (2, 4, 16, 16), dtype=jnp.float32)
    target = (jax.random.uniform(kt, (2, 4, 16, 16)) > 0.5).astype(jnp.float32)

    out = sigmoid_cross_entropy_loss(x, target)
    jax.block_until_ready(out)
    assert jnp.allclose(out, _ref(x, target), rtol=1e-5, atol=1e-6), (
        out, _ref(x, target))

    # Extra coverage: partial last block, non-128-aligned fallback, bf16 path.
    for idx, (shape, dtype) in enumerate([
            ((2, 4, 16, 20), jnp.float32),   # rows=20 -> partial final block
            ((3, 5, 9, 7), jnp.float32),     # 945 elems -> pure-JAX fallback
            ((2, 4, 16, 16), jnp.bfloat16),  # bf16 streaming, (16,128) tiling
    ]):
        kx, kt = jax.random.split(jax.random.PRNGKey(idx + 1))
        xi = jax.random.normal(kx, shape, dtype=jnp.float32).astype(dtype)
        ti = (jax.random.uniform(kt, shape) > 0.5).astype(dtype)
        oi = sigmoid_cross_entropy_loss(xi, ti)
        jax.block_until_ready(oi)
        ri = _ref(xi, ti)
        assert jnp.allclose(oi, ri, rtol=1e-5, atol=1e-6), (shape, oi, ri)

    print("KERNEL_OK")
</pallas_src>

<mosaic_0001>
module attributes {stable_mosaic.version = 11 : i64} {
  func.func @_sce_sum_kernel(%arg0: i32, %arg1: i32, %arg2: memref<16x128xf32, #tpu.memory_space<vmem>>, %arg3: memref<16x128xf32, #tpu.memory_space<vmem>>, %arg4: memref<8x128xf32, #tpu.memory_space<vmem>>) attributes {dimension_semantics = [#tpu.dimension_semantics<parallel>, #tpu.dimension_semantics<arbitrary>], iteration_bounds = array<i64: 2, 1>, scalar_prefetch = 0 : i64, scratch_operands = 0 : i64, tpu.core_type = #tpu.core_type<tc>, window_params = [{transform_indices = @transform_0, window_bounds = array<i64: 16, 128>}, {transform_indices = @transform_1, window_bounds = array<i64: 16, 128>}, {transform_indices = @transform_2, window_bounds = array<i64: 8, 128>}]} {
    %c0_i32 = arith.constant 0 : i32
    %0 = arith.cmpi eq, %arg1, %c0_i32 : i32
    %1 = arith.extui %0 : i1 to i32
    %c0_i32_0 = arith.constant 0 : i32
    %2 = arith.cmpi ne, %1, %c0_i32_0 : i32
    scf.if %2 {
      %cst_10 = arith.constant 0.000000e+00 : f32
      %25 = vector.broadcast %cst_10 : f32 to vector<8x128xf32>
      %c0_11 = arith.constant 0 : index
      %c0_12 = arith.constant 0 : index
      %26 = vector.load %arg4[%c0_11, %c0_12] : memref<8x128xf32, #tpu.memory_space<vmem>>, vector<8x128xf32>
      tpu.vector_store %arg4[%c0_11, %c0_12], %25 {strides = array<i32>} : memref<8x128xf32, #tpu.memory_space<vmem>>, vector<8x128xf32>,
    } else {
    }
    %c0 = arith.constant 0 : index
    %c0_1 = arith.constant 0 : index
    %3 = vector.load %arg2[%c0, %c0_1] : memref<16x128xf32, #tpu.memory_space<vmem>>, vector<16x128xf32>
    %c0_2 = arith.constant 0 : index
    %c0_3 = arith.constant 0 : index
    %4 = vector.load %arg3[%c0_2, %c0_3] : memref<16x128xf32, #tpu.memory_space<vmem>>, vector<16x128xf32>
    %cst = arith.constant 0.000000e+00 : f32
    %5 = vector.broadcast %cst : f32 to vector<16x128xf32>
    %6 = arith.subf %5, %3 : vector<16x128xf32>
    %7 = arith.mulf %6, %4 : vector<16x128xf32>
    %cst_4 = arith.constant 0.000000e+00 : f32
    %8 = vector.broadcast %cst_4 : f32 to vector<16x128xf32>
    %9 = arith.maximumf %3, %8 : vector<16x128xf32>
    %10 = arith.addf %7, %9 : vector<16x128xf32>
    %11 = math.absf %3 : vector<16x128xf32>
    %cst_5 = arith.constant 0.000000e+00 : f32
    %12 = vector.broadcast %cst_5 : f32 to vector<16x128xf32>
    %13 = arith.subf %12, %11 : vector<16x128xf32>
    %14 = math.exp %13 : vector<16x128xf32>
    %15 = math.log1p %14 : vector<16x128xf32>
    %16 = arith.addf %10, %15 : vector<16x128xf32>
    %c1_i32 = arith.constant 1 : i32
    %17 = arith.muli %arg0, %c1_i32 : i32
    %18 = arith.addi %17, %arg1 : i32
    %c1_i32_6 = arith.constant 1 : i32
    %19 = arith.cmpi slt, %18, %c1_i32_6 : i32
    %20 = arith.extui %19 : i1 to i32
    %c0_i32_7 = arith.constant 0 : i32
    %21 = arith.cmpi ne, %20, %c0_i32_7 : i32
    scf.if %21 {
      %c0_10 = arith.constant 0 : index
      %c0_11 = arith.constant 0 : index
      %25 = vector.load %arg4[%c0_10, %c0_11] : memref<8x128xf32, #tpu.memory_space<vmem>>, vector<8x128xf32>
      %26 = vector.shape_cast %16 : vector<16x128xf32> to vector<2x8x128xf32>
      %cst_12 = arith.constant dense<0.000000e+00> : vector<8x128xf32>
      %27 = vector.multi_reduction <add>, %26, %cst_12 [0] : vector<2x8x128xf32> to vector<8x128xf32>
      %28 = arith.addf %25, %27 : vector<8x128xf32>
      %c0_13 = arith.constant 0 : index
      %c0_14 = arith.constant 0 : index
      %29 = vector.load %arg4[%c0_13, %c0_14] : memref<8x128xf32, #tpu.memory_space<vmem>>, vector<8x128xf32>
      tpu.vector_store %arg4[%c0_13, %c0_14], %28 {strides = array<i32>} : memref<8x128xf32, #tpu.memory_space<vmem>>, vector<8x128xf32>,
    } else {
    }
    %c1_i32_8 = arith.constant 1 : i32
    %22 = arith.cmpi sge, %18, %c1_i32_8 : i32
    %23 = arith.extui %22 : i1 to i32
    %c0_i32_9 = arith.constant 0 : i32
    %24 = arith.cmpi ne, %23, %c0_i32_9 : i32
    scf.if %24 {
      %c16_i32 = arith.constant 16 : i32
      %25 = arith.muli %18, %c16_i32 : i32
      %26 = tpu.iota {dimensions = array<i32: 0>} : vector<16x128xi32>
      %27 = vector.broadcast %25 : i32 to vector<16x128xi32>
      %28 = arith.addi %27, %26 : vector<16x128xi32>
      %c0_10 = arith.constant 0 : index
      %c0_11 = arith.constant 0 : index
      %29 = vector.load %arg4[%c0_10, %c0_11] : memref<8x128xf32, #tpu.memory_space<vmem>>, vector<8x128xf32>
      %c16_i32_12 = arith.constant 16 : i32
      %30 = vector.broadcast %c16_i32_12 : i32 to vector<16x128xi32>
      %31 = arith.cmpi slt, %28, %30 : vector<16x128xi32>
      %cst_13 = arith.constant 0.000000e+00 : f32
      %32 = vector.broadcast %cst_13 : f32 to vector<16x128xf32>
      %33 = arith.select %31, %16, %32 : vector<16x128xi1>, vector<16x128xf32>
      %34 = vector.shape_cast %33 : vector<16x128xf32> to vector<2x8x128xf32>
      %cst_14 = arith.constant dense<0.000000e+00> : vector<8x128xf32>
      %35 = vector.multi_reduction <add>, %34, %cst_14 [0] : vector<2x8x128xf32> to vector<8x128xf32>
      %36 = arith.addf %29, %35 : vector<8x128xf32>
      %c0_15 = arith.constant 0 : index
      %c0_16 = arith.constant 0 : index
      %37 = vector.load %arg4[%c0_15, %c0_16] : memref<8x128xf32, #tpu.memory_space<vmem>>, vector<8x128xf32>
      tpu.vector_store %arg4[%c0_15, %c0_16], %36 {strides = array<i32>} : memref<8x128xf32, #tpu.memory_space<vmem>>, vector<8x128xf32>,
    } else {
    }
    return
  }
  func.func @transform_0(%arg0: i32, %arg1: i32) -> (i32, i32) {
    %c1_i32 = arith.constant 1 : i32
    %0 = arith.muli %arg0, %c1_i32 : i32
    %1 = arith.addi %0, %arg1 : i32
    %c0_i32 = arith.constant 0 : i32
    %2 = arith.minsi %1, %c0_i32 : i32
    %c0_i32_0 = arith.constant 0 : i32
    %c0_i32_1 = arith.constant 0 : i32
    return %2, %c0_i32_0 : i32, i32
  }
  func.func @transform_1(%arg0: i32, %arg1: i32) -> (i32, i32) {
    %c1_i32 = arith.constant 1 : i32
    %0 = arith.muli %arg0, %c1_i32 : i32
    %1 = arith.addi %0, %arg1 : i32
    %c0_i32 = arith.constant 0 : i32
    %2 = arith.minsi %1, %c0_i32 : i32
    %c0_i32_0 = arith.constant 0 : i32
    %c0_i32_1 = arith.constant 0 : i32
    return %2, %c0_i32_0 : i32, i32
  }
  func.func @transform_2(%arg0: i32, %arg1: i32) -> (i32, i32) {
    %c0_i32 = arith.constant 0 : i32
    %c0_i32_0 = arith.constant 0 : i32
    return %arg0, %c0_i32 : i32, i32
  }
}

</mosaic_0001>

<bundles_post_ra>
// kernel: tpu_custom_call.1
= control target key start
LH: loop header
LB: loop body
LE: loop exit
PB: predicated region body
PF: predicated region fallthrough
CT: control target
= control target key end

     0   :  { %7 = vsyncpa [#allocation3], 0  ;;  %s955_s0 = inlined_call_operand.hbm [shape: f32[16,128], index: 0, kind: input, shape index: {}]   ;;  %s956_s1 = inlined_call_operand.hbm [shape: f32[16,128], index: 1, kind: input, shape index: {}]   ;;  %s957_s2 = inlined_call_operand.hbm [shape: f32[16,128], index: 2, kind: output, shape index: {}]  }
   0x1   :  { %9 = vsyncpa [#allocation3 + $0x1], 0 }
   0x2   :  { %10 = vsyncpa [#allocation6], 0 }
   0x3   :  { %12 = vsyncpa [#allocation6 + $0x1], 0 }
   0x4   :  { %13 = vsyncpa [#allocation4], 0 }
   0x5   :  { %15 = vsyncpa [#allocation4 + $0x1], 0  ;;  %s743_s9 = smov 0   ;;  %s745_s10 = smov 0  }
   0x6   :  { %s747_s11 = smov 0   ;;  %s749_s12 = smov 0  }
   0x7   :  { %s751_s13 = smov 0   ;;  %s753_s14 = smov 0  }
   0x8   :  { %s755_s15 = smov 0   ;;  %s757_s16 = smov 0  }
   0x9 LB: > { %s428_s17 = sadd.s32 4294967295, %s720_s16   ;;  %s429_s18 = sadd.s32 4294967294, %s720_s16   ;;  %s720_s16 = sphi %s757_s16, %s21_s16   ;;  %s716_s15 = sphi %s755_s15, %s976_s15   ;;  %s712_s14 = sphi %s753_s14, %s975_s14   ;;  %s708_s13 = sphi %s751_s13, %s945_s13   ;;  %s704_s12 = sphi %s749_s12, %s974_s12   ;;  %s700_s11 = sphi %s747_s11, %s973_s11   ;;  %s696_s10 = sphi %s745_s10, %s972_s10   ;;  %s692_s9 = sphi %s743_s9, %s971_s9  }
   0xa   : > { %s33_s19 = sadd.s32 1, %s716_s15  ;;  %p689_p1 = scmp.ne.s32.totalorder %s708_s13, 0 }
   0xb   : > { %p35_p0 = scmp.ge.s32.totalorder %s33_s19, 2  ;;  %p54_p2 = scmp.eq.s32.totalorder %s720_s16, 0 }
   0xc   : > { %p59_p3 = scmp.ne.s32.totalorder %s708_s13, %s704_s12  ;;  %p60_p5 = scmp.eq.s32.totalorder %s428_s17, 0 }
   0xd   : > { %s978_s19 = smov (%p35_p0, %s33_s19), 0  ;;  %p789_p4 = por %p689_p1, %p54_p2 }
   0xe   : > { %p793_p6 = por %p60_p5, %p59_p3  ;;  %s101_s22 = ssub.s32 %s716_s15, %s978_s19 }
   0xf   : > { %p102_p7 = scmp.eq.s32.totalorder %s101_s22, 0  ;;  %s104_s23 = sadd.s32 1, %s700_s11 }
  0x10   : > { %s961_s21 = scalar_select %p793_p6, 1, 0 }
  0x11   : > { %s801_s24 = scalar_select %p102_p7, %s700_s11, %s104_s23  }
  0x12   : > { %p114_p8 = scmp.ne.s32.totalorder %s700_s11, %s696_s10  ;;  %p115_p9 = scmp.eq.s32.totalorder %s428_s17, 1 }
  0x13   : > { %p120_p10 = scmp.ne.s32.totalorder %s696_s10, %s692_s9  ;;  %p121_p11 = scmp.eq.s32.totalorder %s429_s18, 1 }
  0x14   : > { %p807_p12 = por %p115_p9, %p114_p8  ;;  %p468_p1 = scmp.lt.s32.totalorder %s720_s16, 2 }
  0x15   : > { %p812_p0 = por %p121_p11, %p120_p10  ;;  %s722_s27 = smov [#allocation2]  }
  0x16   : > { %s962_s25 = scalar_select %p807_p12, 1, 0 }
  0x17   : > { %s963_s26 = scalar_select %p812_p0, 1, 0 }
  0x18   : > { %s155_s28 = sshll.u32 %s722_s27, 4  ;;  %p819_p2 = pnand %p468_p1, %p789_p4  ;;  %s156_s28 = int_to_ptr.vmem [resolvable:$true] %s155_s28 }
  0x19   : > { %s553_s4 = scalar_lea.hbm %s955_s0, 256 }
  0x1a   : > { %p554_p3 = scmp.ne.s32.totalorder %s955_s0, %s553_s4  ;;  %p555_p5 = pneg %p819_p2 }
  0x1b   : > { %p560_p8 = scmp.lt.u32.totalorder %s553_s4, %s553_s4  ;;  %p562_p9 = scmp.lt.u32.totalorder %s553_s4, %s955_s0 }
  0x1c   : > { %p556_p7 = pnand %p555_p5, %p554_p3 }
  0x1d   : > { %p563_p10 = por %p562_p9, %p560_p8 }
  0x1e   : > { %p557_p4 = pneg %p556_p7 }
  0x20   : > { %p564_p11 = pnand %p563_p10, %p557_p4 }
  0x22   : > { %567 = shalt.err (!%p564_p11)
}
  0x23   : > { %s568_s12 = scalar_lea.vmem %s156_s28, 256  ;;  %s575_s17 = scalar_lea.vmem %s156_s28, 512 }
  0x24   : > { %p569_p1 = scmp.ne.s32.totalorder %s156_s28, %s568_s12  ;;  %p576_p12 = scmp.lt.s32.totalorder %s156_s28, %s156_s28 }
  0x25   : > { %p577_p6 = scmp.lt.s32.totalorder %s575_s17, %s568_s12 }
  0x26   : > { %p571_p13 = pnand %p569_p1, %p555_p5 }
  0x27   : > { %p578_p3 = por %p577_p6, %p576_p12 }
  0x28   : > { %p572_p0 = pneg %p571_p13 }
  0x2a   : > { %p579_p7 = pnand %p578_p3, %p572_p0 }
  0x2c   : > { %582 = shalt.err (!%p579_p7)
}
  0x2d   : > { %s723_s18 = smov 128   ;;  %s724_s20 = smov 8  }
  0x2e   : > { %460 = dma.hbm_to_vmem [thread:$0]  (!%p819_p2), %s955_s0, 256, %s156_s28, [#allocation3], %s723_s18, %s723_s18, %s724_s20  }
  0x2f   : > { %p438_p13 = scmp.ge.s32.totalorder %s720_s16, 1  ;;  %p187_p4 = scmp.lt.s32.totalorder %s720_s16, 3 }
  0x30   : > { %s725_s30 = smov [#allocation5]   ;;  %s583_s6 = scalar_lea.hbm %s956_s1, 256 }
  0x31   : > { %p850_p8 = pnand %p438_p13, %p187_p4  ;;  %s179_s3 = sshll.u32 %s725_s30, 4  ;;  %s180_s3 = int_to_ptr.vmem [resolvable:$true] %s179_s3 }
  0x32   : > { %p584_p6 = scmp.ne.s32.totalorder %s956_s1, %s583_s6  ;;  %p590_p9 = scmp.lt.u32.totalorder %s583_s6, %s583_s6 }
  0x33   : > { %s965_s27 = scalar_select %p850_p8, 1, 0 }
  0x34   : > { %p586_p12 = pnand %p584_p6, %p555_p5  ;;  %p592_p10 = scmp.lt.u32.totalorder %s583_s6, %s956_s1 }
  0x36   : > { %p587_p0 = pneg %p586_p12  ;;  %p593_p11 = por %p592_p10, %p590_p9 }
  0x38   : > { %p594_p1 = pnand %p593_p11, %p587_p0 }
  0x3a   : > { %597 = shalt.err (!%p594_p1)
}
  0x3b   : > { %s598_s17 = scalar_lea.vmem %s180_s3, 256  ;;  %s605_s22 = scalar_lea.vmem %s180_s3, 512 }
  0x3c   : > { %p599_p3 = scmp.ne.s32.totalorder %s180_s3, %s598_s17  ;;  %p606_p4 = scmp.lt.s32.totalorder %s180_s3, %s180_s3 }
  0x3d   : > { %p607_p8 = scmp.lt.s32.totalorder %s605_s22, %s598_s17 }
  0x3e   : > { %p601_p7 = pnand %p599_p3, %p555_p5 }
  0x3f   : > { %p608_p6 = por %p607_p8, %p606_p4 }
  0x40   : > { %p602_p13 = pneg %p601_p7 }
  0x42   : > { %p609_p12 = pnand %p608_p6, %p602_p13 }
  0x44   : > { %612 = shalt.err (!%p609_p12)
}
  0x45   : > { %463 = dma.hbm_to_vmem [thread:$0]  (!%p819_p2), %s956_s1, 256, %s180_s3, [#allocation6], %s723_s18, %s723_s18, %s724_s20  }
  0x46   : > { %p966_p0 = scmp.ne.s32.totalorder %s965_s27, 0 }
  0x47   : > { %s193_s4 = sand.u32 (!%p966_p0), 1, %s708_s13   ;;  %p967_p5 = scmp.ne.s32.totalorder (!%p966_p0), %s961_s21, 0 }
  0x48   : > { %191 = sbr.rel (%p966_p0) target bundleno = 165 (0xa5), region = 28  ;;  %s439_s5 = sshll.u32 (!%p966_p0), %s193_s4, 4 }
  0x49   : > { %s194_s6 = scalar_lea.sflag (!%p966_p0), [#allocation3], %s193_s4  ;;  %s197_s7 = scalar_lea.vmem (!%p966_p0), [#allocation2], %s439_s5 }
  0x4f   : > { %678 = dma.done.wait (%p967_p5), %s194_s6, 256  }
  0x50   : > { %680 = vsyncadd (%p967_p5), %s194_s6, 4294967040  ;;  %s203_s29 = scalar_lea.sflag [#allocation6], %s193_s4  ;;  %s206_s8 = scalar_lea.vmem [#allocation5], %s439_s5 }
  0x51   : > { %682 = dma.done.wait (%p967_p5), %s203_s29, 256  }
  0x52   : > { %684 = vsyncadd (%p967_p5), %s203_s29, 4294967040  ;;  %s229_s18 = sand.u32 1, %s696_s10   ;;  %v726_v0 = vmov 0.0   ;;  %v245_v1 = vld [vmem:[%s197_s7] sm:$0xff]  ;;  %v246_v2 = vld [vmem:[%s197_s7 + $0x8] sm:$0xff]  ;;  %p442_p2 = scmp.ge.s32.totalorder %s712_s14, 1 }
  0x53   : > { %s441_s20 = sshll.u32 %s229_s18, 3  ;;  %v257_v3 = vand.u32 2147483647, %v245_v1  ;;  %v258_v4 = vand.u32 2147483647, %v246_v2  ;;  %v249_v14 = vsub.f32 0.0, %v245_v1 }
  0x54   : > { %s891_s27 = scalar_lea.vmem [#allocation7], %s441_s20  ;;  %v247_v16 = vld [vmem:[%s206_s8] sm:$0xff]  ;;  %v250_v17 = vsub.f32 0.0, %v246_v2  ;;  %v248_v18 = vld [vmem:[%s206_s8 + $0x8] sm:$0xff]  ;;  %v253_v21 = vmax.f32 %v245_v1, 0.0  ;;  %v254_v25 = vmax.f32 %v246_v2, 0.0 }
  0x55   : > { %244 = vst [vmem:[%s891_s27] sm:$0xff] %v726_v0  ;;  %v259_v5 = vsub.f32 0.0, %v257_v3  ;;  %v260_v6 = vsub.f32 0.0, %v258_v4  ;;  %v251_v20 = vmul.f32 %v249_v14, %v247_v16 }
  0x56   : > { %v252_v24 = vmul.f32 %v250_v17, %v248_v18 }
  0x57   : > { %v261_v7 = vmul.f32 1.442695, %v259_v5  ;;  %v263_v8 = vmul.f32 1.442695, %v260_v6  ;;  %v255_v29 = vadd.f32 %v253_v21, %v251_v20 }
  0x58   : > { %v256_v32 = vadd.f32 %v254_v25, %v252_v24 }
  0x59   : > { %545 = vpow2.f32 %v261_v7 }
  0x5a   : > { %547 = vpow2.f32 %v263_v8 }
  0x5c   : > { %v290_v39 = vld [vmem:[%s891_s27] sm:$0xff] (!%p442_p2) }
  0x63   : > { %v546_v9 = vpop.eup %545 }
  0x64   : > { %v548_v10 = vpop.eup %547  ;;  %v265_v11 = vadd.f32 1.0, %v546_v9  ;;  %v268_v13 = vmul.f32 -0.5, %v546_v9  ;;  %v271_v22 = vand.u32 2147483647, %v546_v9 }
  0x65   : > { %v274_v12 = vadd.f32 1.0, %v548_v10  ;;  %v277_v15 = vmul.f32 -0.5, %v548_v10  ;;  %v280_v26 = vand.u32 2147483647, %v548_v10 }
  0x66   : > { %549 = vlog2.f32 %v265_v11  ;;  %v269_v19 = vadd.f32 1.0, %v268_v13  ;;  %vm272_vm0 = vcmp.lt.f32.partialorder %v271_v22, 0.0004427343 }
  0x67   : > { %551 = vlog2.f32 %v274_v12  ;;  %v278_v23 = vadd.f32 1.0, %v277_v15  ;;  %vm281_vm1 = vcmp.lt.f32.partialorder %v280_v26, 0.0004427343 }
  0x68   : > { %v270_v27 = vmul.f32 %v546_v9, %v269_v19 }
  0x69   : > { %v279_v30 = vmul.f32 %v548_v10, %v278_v23 }
  0x6f   : > { %289 = sbr.rel (%p442_p2) target bundleno = 124 (0x7c), region = 44 }
  0x70   : > { %v550_v28 = vpop.eup %549 }
  0x71   : > { %v552_v31 = vpop.eup %551  ;;  %v267_v33 = vmul.f32 0.6931472, %v550_v28 }
  0x72   : > { %v276_v34 = vmul.f32 0.6931472, %v552_v31 }
  0x73   : > { %v273_v35 = vsel %vm272_vm0, %v270_v27, %v267_v33 }
  0x74   : > { %v282_v36 = vsel %vm281_vm1, %v279_v30, %v276_v34  ;;  %v283_v37 = vadd.f32 %v273_v35, %v255_v29 }
  0x75   : > { %v284_v38 = vadd.f32 %v282_v36, %v256_v32 }
  0x77   : > { %v291_v40 = vadd.f32 %v284_v38, %v283_v37 }
  0x79   : > { %v292_v41 = vadd.f32 %v291_v40, %v290_v39 }
  0x7b   : > { %293 = vst [vmem:[%s891_s27] sm:$0xff] %v292_v41 }
  0x7c PF: > { %p443_p8 = scmp.lt.s32.totalorder %s712_s14, 1 }
  0x7d   : > { %s444_s21 = sshll.u32 (!%p443_p8), %s712_s14, 4  ;;  %v299_v42 = vlaneseq (!%p443_p8) }
  0x7e   : > { %297 = sbr.rel (%p443_p8) target bundleno = 140 (0x8c), region = 48  ;;  %v302_v43 = vstv (!%p443_p8), %s444_s21 }
  0x7f   : > { %v300_v44 = vshrl.u32 (!%p443_p8), %v299_v42, 7 }
  0x81   : > { %v301_v45 = vadd.s32 (!%p443_p8), 8, %v300_v44  ;;  %v303_v46 = vadd.s32 (!%p443_p8), %v302_v43, %v300_v44 }
  0x82   : > { %v305_v49 = vld [vmem:[%s891_s27] sm:$0xff] (!%p443_p8) }
  0x83   : > { %v304_v47 = vadd.s32 (!%p443_p8), %v302_v43, %v301_v45  ;;  %vm306_vm2 = vcmp.lt.s32.totalorder (!%p443_p8), %v303_v46, 16 }
  0x84   : > { %v308_v48 = vsel (!%p443_p8), %vm306_vm2, %v283_v37, 0.0 }
  0x85   : > { %vm307_vm3 = vcmp.lt.s32.totalorder %v304_v47, 16 }
  0x86   : > { %v309_v50 = vsel %vm307_vm3, %v284_v38, 0.0 }
  0x87   : > { %v310_v51 = vadd.f32 %v309_v50, %v308_v48 }
  0x89   : > { %v311_v52 = vadd.f32 %v310_v51, %v305_v49 }
  0x8b   : > { %312 = vst [vmem:[%s891_s27] sm:$0xff] %v311_v52 }
  0x8c PF: > { %s446_s3 = sshll.u32 %s712_s14, 7  ;;  %s327_s22 = sshll.u32 %s891_s27, 4  ;;  %s328_s22 = int_to_ptr.vmem [resolvable:$true] %s327_s22 }
  0x8d   : > { %s905_s17 = scalar_lea.hbm %s957_s2, %s446_s3  ;;  %s314_s23 = scalar_lea.sflag [#allocation4], %s229_s18 }
  0x8e   : > { %s613_s30 = scalar_lea.vmem %s328_s22, 128  ;;  %p968_p10 = scmp.ne.s32.totalorder %s962_s25, 0 }
  0x8f   : > { %p614_p9 = scmp.ne.s32.totalorder %s328_s22, %s613_s30  ;;  %s727_s4 = smov [#allocation7]  }
  0x90   : > { %s617_s5 = sshll.u32 %s727_s4, 4  ;;  %s618_s5 = int_to_ptr.vmem [resolvable:$false] %s617_s5 }
  0x91   : > { %p615_p11 = pnand %p614_p9, %p968_p10  ;;  %s619_s6 = scalar_lea.vmem %s618_s5, 256 }
  0x92   : > { %p620_p3 = scmp.lt.s32.totalorder %s328_s22, %s618_s5  ;;  %p621_p7 = scmp.lt.s32.totalorder %s619_s6, %s613_s30 }
  0x93   : > { %p616_p1 = pneg %p615_p11 }
  0x94   : > { %p622_p13 = por %p621_p7, %p620_p3 }
  0x96   : > { %p623_p4 = pnand %p622_p13, %p616_p1 }
  0x98   : > { %626 = shalt.err (!%p623_p4)
}
  0x99   : > { %s627_s14 = scalar_lea.hbm %s905_s17, 128  ;;  %s631_s8 = scalar_lea.hbm %s957_s2, 256 }
  0x9a   : > { %p628_p6 = scmp.ne.s32.totalorder %s905_s17, %s627_s14  ;;  %p632_p5 = scmp.lt.u32.totalorder %s905_s17, %s957_s2 }
  0x9b   : > { %p633_p2 = scmp.lt.u32.totalorder %s631_s8, %s627_s14  ;;  %p635_p9 = scmp.lt.u32.totalorder %s627_s14, %s905_s17 }
  0x9c   : > { %p629_p12 = pnand %p628_p6, %p968_p10 }
  0x9d   : > { %p634_p8 = por %p633_p2, %p632_p5 }
  0x9e   : > { %p630_p0 = pneg %p629_p12 }
  0x9f   : > { %p636_p11 = por %p635_p9, %p634_p8 }
  0xa1   : > { %p637_p1 = pnand %p636_p11, %p630_p0 }
  0xa3   : > { %640 = shalt.err (!%p637_p1)
}
  0xa4   : > { %455 = dma.vmem_to_hbm [thread:$0]  (%p968_p10), %s328_s22, 128, %s905_s17, %s314_s23  }
  0xa5 PF: > { %s339_s27 = sand.u32 1, %s692_s9   ;;  %p969_p3 = scmp.ne.s32.totalorder %s963_s26, 0 }
  0xa6   : > { %p970_p7 = scmp.ge.s32.totalorder %s720_s16, 2  ;;  %s340_s21 = scalar_lea.sflag [#allocation4], %s339_s27 }
  0xa8   : > { %p465_p13 = pnand %p970_p7, %p969_p3 }
  0xaa   : > { %686 = dma.done.wait (!%p465_p13), %s340_s21, 128  }
  0xab   : > { %688 = vsyncadd (!%p465_p13), %s340_s21, 4294967168  ;;  %s21_s16 = sadd.s32 1, %s720_s16   ;;  %s971_s9 = smov %s696_s10 }
  0xac   : > { %p18_p4 = scmp.ge.s32.totalorder %s21_s16, 4   ;;  %s972_s10 = smov %s700_s11 }
  0xad   : > { %s973_s11 = smov %s801_s24  ;;  %s974_s12 = smov %s708_s13 }
  0xae   : > { %s945_s13 = smov 0   ;;  %s975_s14 = smov %s716_s15 }
  0xaf   : > { %s976_s15 = smov %s978_s19  ;;  %20 = sbr.rel (!%p18_p4) target bundleno = 9 (0x9), region = 98 }
  0xb6   :  { %345 = vsyncpa [#allocation3], 1 }
  0xb7   :  { %347 = vsyncpa [#allocation3 + $0x1], 1 }
  0xb8   :  { %348 = vsyncpa [#allocation6], 1 }
  0xb9   :  { %350 = vsyncpa [#allocation6 + $0x1], 1 }
  0xba   :  { %351 = vsyncpa [#allocation4], 1 }
  0xbb   :  { %353 = vsyncpa [#allocation4 + $0x1], 1 }

</bundles_post_ra>
